<compile_context>
chip_gen: v7x
topology: tpu7x:2x2x1
jax: 0.10.0
libtpu: 0.0.40
codegen_flags: <defaults>
</compile_context>

<pallas_src>
import functools
import math

import jax
import jax.numpy as jnp
from jax.experimental import pallas as pl
from jax.experimental.pallas import tpu as pltpu


def _split_mask_kernel(x_ref, plus_ref, sub_ref, *, split, period):
    """Write x's first `split` channels (mod `period`) to plus, the rest to sub."""
    x = x_ref[...]
    col = jax.lax.broadcasted_iota(jnp.int32, x.shape, dimension=x.ndim - 1)
    if period < x.shape[-1]:
        # lane-dense packing: channel index repeats every `period` lanes
        col = col % period
    keep = col < split
    zeros = jnp.zeros_like(x)
    plus_ref[...] = jnp.where(keep, x, zeros)
    sub_ref[...] = jnp.where(keep, zeros, x)


def _row_align(dtype):
    itemsize = jnp.dtype(dtype).itemsize
    if itemsize >= 4:
        return 8
    if itemsize == 2:
        return 16
    return 32


def _round_up(n, m):
    return ((n + m - 1) // m) * m


_TARGET_TILE_BYTES = 4 * 1024 * 1024      # per-buffer tile; 6x fits 48 MiB scoped VMEM
_VMEM_LIMIT_BYTES = 48 * 1024 * 1024      # safe on v5e/v6e (128 MiB) and v7x (64 MiB)


def _masked_split_2d(x2d, split, period):
    """Run the masked channel split on a 2-D (rows, lanes) view."""
    R, W = x2d.shape
    dtype = x2d.dtype
    align = _row_align(dtype)
    itemsize = jnp.dtype(dtype).itemsize
    row_bytes = max(1, W * itemsize)

    # Largest sublane-aligned row tile under the byte budget.
    tm = max(align, (_TARGET_TILE_BYTES // row_bytes) // align * align)
    tm = min(tm, _round_up(R, align))
    # Prefer >= 2 grid steps (megacore sharding on v7x) when there is enough data.
    if -(-R // tm) < 2 and R > align:
        tm = max(align, _round_up(-(-R // 2), align))

    grid = (-(-R // tm),)  # cdiv; Pallas handles the ragged last block

    kernel = functools.partial(_split_mask_kernel, split=split, period=period)
    plus2d, sub2d = pl.pallas_call(
        kernel,
        out_shape=(
            jax.ShapeDtypeStruct((R, W), dtype),
            jax.ShapeDtypeStruct((R, W), dtype),
        ),
        grid=grid,
        in_specs=[pl.BlockSpec((tm, W), lambda i: (i, 0))],
        out_specs=(
            pl.BlockSpec((tm, W), lambda i: (i, 0)),
            pl.BlockSpec((tm, W), lambda i: (i, 0)),
        ),
        compiler_params=pltpu.CompilerParams(
            dimension_semantics=("parallel",),
            vmem_limit_bytes=_VMEM_LIMIT_BYTES,
        ),
    )(x2d)
    return plus2d, sub2d


class FeatureReroute:
    """JAX/Pallas port of the PyTorch FeatureReroute module (forward only)."""

    def __init__(self, num_channel, chanel_axis=-1, ratio=0.5, use_dns=True, use_fr=True):
        self.ratio = max(min(ratio, 1.0), 0.0)
        self.use_fr = use_fr
        self.use_dns = use_dns
        self.num_channel = num_channel
        self.chanel_axis = chanel_axis
        # Mirror the PyTorch module exactly (uses the unclamped ratio argument).
        self.feature_num1 = round(num_channel * ratio)
        self.feature_num2 = num_channel - self.feature_num1

    def __call__(self, x):
        if not self.use_dns:
            return (x, x)

        # Edge ratios: trivial, no kernel needed (pure glue).
        if self.ratio >= 1.0:
            return (x, x) if self.use_fr else (x, jnp.zeros_like(x))
        if self.ratio <= 0.0:
            return (x, x) if self.use_fr else (jnp.zeros_like(x), x)

        # 0 < ratio < 1, use_fr=True: forward values are identically (x, x);
        # skip the kernel entirely (detach only changes autograd, not values).
        if self.use_fr:
            return (x, x)

        # 0 < ratio < 1, use_fr=False: masked channel split on TPU.
        axis = self.chanel_axis % x.ndim
        x_cl = jnp.moveaxis(x, axis, -1)
        lead_shape = x_cl.shape[:-1]
        C = x_cl.shape[-1]
        assert C == self.num_channel
        M = math.prod(lead_shape) if lead_shape else 1
        x2d = x_cl.reshape(M, C)

        split, period = self.feature_num1, C
        itemsize = jnp.dtype(x2d.dtype).itemsize
        align = _row_align(x2d.dtype)

        # Lane-dense packing: fold k rows so the lane dim is a multiple of 128.
        # Pure row-major reshape (no data movement); mask uses (lane % C).
        if C % 128 != 0:
            k = 128 // math.gcd(C, 128)
            packed_w = k * C
            if M % k == 0 and packed_w * itemsize * align <= _TARGET_TILE_BYTES:
                x2d = x2d.reshape(M // k, packed_w)
        # else: C already lane-dense; use (M, C) directly.

        plus2d, sub2d = _masked_split_2d(x2d, split, period)

        def _restore(y):
            y = y.reshape(*lead_shape, C)
            return jnp.moveaxis(y, -1, axis)

        return (_restore(plus2d), _restore(sub2d))


def _reference(x, module):
    """Pure-jnp reference matching the PyTorch forward."""
    if not module.use_dns:
        return (x, x)
    if module.ratio >= 1.0:
        return (x, x) if module.use_fr else (x, jnp.zeros_like(x))
    if module.ratio <= 0.0:
        return (x, x) if module.use_fr else (jnp.zeros_like(x), x)
    axis = module.chanel_axis % x.ndim
    n1 = module.feature_num1
    tmp1, tmp2 = jnp.split(x, [n1], axis=axis)
    if module.use_fr:
        return (jnp.concatenate([tmp1, tmp2], axis=axis), x)
    x_plus = jnp.concatenate([tmp1, jnp.zeros_like(tmp2)], axis=axis)
    x_sub = jnp.concatenate([jnp.zeros_like(tmp1), tmp2], axis=axis)
    return (x_plus, x_sub)


if __name__ == "__main__":
    key = jax.random.PRNGKey(0)
    B, N, C = 2, 16, 32  # channels-last (chanel_axis=-1)
    x = jax.random.normal(key, (B, N, C), dtype=jnp.float32)

    ok = True

    # Mid-ratio: use_fr=False hits the Pallas kernel, use_fr=True short-circuits.
    for ratio in (0.5, 0.25):
        for use_fr in (True, False):
            mod = FeatureReroute(C, chanel_axis=-1, ratio=ratio,
                                 use_dns=True, use_fr=use_fr)
            xp, xs = mod(x)
            jax.block_until_ready(xp)
            jax.block_until_ready(xs)
            rp, rs = _reference(x, mod)
            ok &= bool(jnp.allclose(xp, rp)) and bool(jnp.allclose(xs, rs))

    # Ragged leading dims + bf16 (exercises dtype-aware tiles and ragged blocks).
    x2 = jax.random.normal(jax.random.PRNGKey(1), (3, 5, 32), dtype=jnp.bfloat16)
    mod = FeatureReroute(32, chanel_axis=-1, ratio=0.5, use_dns=True, use_fr=False)
    xp, xs = mod(x2)
    jax.block_until_ready(xp)
    jax.block_until_ready(xs)
    rp, rs = _reference(x2, mod)
    ok &= bool(jnp.allclose(xp, rp)) and bool(jnp.allclose(xs, rs))

    # Edge/trivial branches (pure glue, no kernel).
    mod = FeatureReroute(C, ratio=1.0, use_fr=False)
    xp, xs = mod(x)
    rp, rs = _reference(x, mod)
    ok &= bool(jnp.allclose(xp, rp)) and bool(jnp.allclose(xs, rs))

    mod = FeatureReroute(C, use_dns=False)
    xp, xs = mod(x)
    ok &= bool(jnp.allclose(xp, x)) and bool(jnp.allclose(xs, x))

    print("KERNEL_OK" if ok else "MISMATCH")
</pallas_src>

<mosaic_0001>
module attributes {stable_mosaic.version = 11 : i64} {
  func.func @_split_mask_kernel(%arg0: i32, %arg1: memref<8x128xf32, #tpu.memory_space<vmem>>, %arg2: memref<8x128xf32, #tpu.memory_space<vmem>>, %arg3: memref<8x128xf32, #tpu.memory_space<vmem>>) attributes {dimension_semantics = [#tpu.dimension_semantics<parallel>], iteration_bounds = array<i64: 1>, scalar_prefetch = 0 : i64, scratch_operands = 0 : i64, tpu.core_type = #tpu.core_type<tc>, window_params = [{transform_indices = @transform_0, window_bounds = array<i64: 8, 128>}, {transform_indices = @transform_1, window_bounds = array<i64: 8, 128>}, {transform_indices = @transform_2, window_bounds = array<i64: 8, 128>}]} {
    %c0 = arith.constant 0 : index
    %c0_0 = arith.constant 0 : index
    %0 = vector.load %arg1[%c0, %c0_0] : memref<8x128xf32, #tpu.memory_space<vmem>>, vector<8x128xf32>
    %1 = tpu.iota {dimensions = array<i32: 1>} : vector<8x128xi32>
    %c32_i32 = arith.constant 32 : i32
    %c0_i32 = arith.constant 0 : i32
    %2 = arith.cmpi eq, %c32_i32, %c0_i32 : i32
    %c1_i32 = arith.constant 1 : i32
    %3 = arith.select %2, %c1_i32, %c32_i32 : i32
    %4 = vector.broadcast %3 : i32 to vector<8x128xi32>
    %5 = arith.remsi %1, %4 : vector<8x128xi32>
    %c0_i32_1 = arith.constant 0 : i32
    %6 = vector.broadcast %c0_i32_1 : i32 to vector<8x128xi32>
    %7 = arith.cmpi ne, %5, %6 : vector<8x128xi32>
    %c0_i32_2 = arith.constant 0 : i32
    %8 = vector.broadcast %c0_i32_2 : i32 to vector<8x128xi32>
    %9 = arith.cmpi slt, %5, %8 : vector<8x128xi32>
    %c0_i32_3 = arith.constant 0 : i32
    %10 = arith.cmpi slt, %3, %c0_i32_3 : i32
    %11 = vector.broadcast %10 : i1 to vector<8x128xi1>
    %12 = vector.broadcast %11 : vector<8x128xi1> to vector<8x128xi1>
    %13 = arith.xori %9, %12 : vector<8x128xi1>
    %14 = arith.andi %13, %7 : vector<8x128xi1>
    %15 = vector.broadcast %3 : i32 to vector<8x128xi32>
    %16 = arith.addi %5, %15 : vector<8x128xi32>
    %17 = arith.select %14, %16, %5 : vector<8x128xi1>, vector<8x128xi32>
    %c16_i32 = arith.constant 16 : i32
    %18 = vector.broadcast %c16_i32 : i32 to vector<8x128xi32>
    %19 = arith.cmpi slt, %17, %18 : vector<8x128xi32>
    %cst = arith.constant 0.000000e+00 : f32
    %20 = vector.broadcast %cst : f32 to vector<8x128xf32>
    %21 = arith.select %19, %0, %20 : vector<8x128xi1>, vector<8x128xf32>
    %c0_4 = arith.constant 0 : index
    %c0_5 = arith.constant 0 : index
    %22 = vector.load %arg2[%c0_4, %c0_5] : memref<8x128xf32, #tpu.memory_space<vmem>>, vector<8x128xf32>
    tpu.vector_store %arg2[%c0_4, %c0_5], %21 {strides = array<i32>} : memref<8x128xf32, #tpu.memory_space<vmem>>, vector<8x128xf32>,
    %23 = arith.select %19, %20, %0 : vector<8x128xi1>, vector<8x128xf32>
    %c0_6 = arith.constant 0 : index
    %c0_7 = arith.constant 0 : index
    %24 = vector.load %arg3[%c0_6, %c0_7] : memref<8x128xf32, #tpu.memory_space<vmem>>, vector<8x128xf32>
    tpu.vector_store %arg3[%c0_6, %c0_7], %23 {strides = array<i32>} : memref<8x128xf32, #tpu.memory_space<vmem>>, vector<8x128xf32>,
    return
  }
  func.func @transform_0(%arg0: i32) -> (i32, i32) {
    %c0_i32 = arith.constant 0 : i32
    %c0_i32_0 = arith.constant 0 : i32
    return %arg0, %c0_i32 : i32, i32
  }
  func.func @transform_1(%arg0: i32) -> (i32, i32) {
    %c0_i32 = arith.constant 0 : i32
    %c0_i32_0 = arith.constant 0 : i32
    return %arg0, %c0_i32 : i32, i32
  }
  func.func @transform_2(%arg0: i32) -> (i32, i32) {
    %c0_i32 = arith.constant 0 : i32
    %c0_i32_0 = arith.constant 0 : i32
    return %arg0, %c0_i32 : i32, i32
  }
}

</mosaic_0001>

<bundles_post_ra>
// kernel: tpu_custom_call.1
= control target key start
LH: loop header
LB: loop body
LE: loop exit
PB: predicated region body
PF: predicated region fallthrough
CT: control target
= control target key end

     0   :  { %8 = vsyncpa [#allocation3], 0  ;;  %s202_s0 = inlined_call_operand.hbm [shape: f32[8,128], index: 0, kind: input, shape index: {}]   ;;  %s203_s1 = inlined_call_operand.hbm [shape: f32[8,128], index: 1, kind: output, shape index: {0}]   ;;  %s204_s2 = inlined_call_operand.hbm [shape: f32[8,128], index: 2, kind: output, shape index: {1}]  }
   0x1   :  { %9 = vsyncpa [#allocation4], 0 }
   0x2   :  { %10 = vsyncpa [#allocation7], 0  ;;  %s148_s9 = smov [#allocation2]   ;;  %s76_s13 = scalar_lea.hbm %s202_s0, 128 }
   0x3   :  { %s17_s10 = sshll.u32 %s148_s9, 4  ;;  %p77_p0 = scmp.ne.s32.totalorder %s202_s0, %s76_s13  ;;  %s18_s10 = int_to_ptr.vmem [resolvable:$true] %s17_s10 }
   0x4   :  { %p80_p1 = scmp.lt.u32.totalorder %s76_s13, %s202_s0 }
   0x6   :  { %p82_p2 = pnand %p80_p1, %p77_p0 }
   0x8   :  { %85 = shalt.err (!%p82_p2)
}
   0x9   :  { %s86_s18 = scalar_lea.vmem %s18_s10, 128  ;;  %p91_p4 = scmp.lt.s32.totalorder %s18_s10, %s18_s10 }
   0xa   :  { %p87_p3 = scmp.ne.s32.totalorder %s18_s10, %s86_s18  ;;  %p92_p5 = scmp.lt.s32.totalorder %s86_s18, %s86_s18 }
   0xc   :  { %p93_p6 = por %p92_p5, %p91_p4 }
   0xe   :  { %p94_p7 = pnand %p93_p6, %p87_p3 }
  0x10   :  { %97 = shalt.err (!%p94_p7)
}
  0x11   :  { %20 = dma.hbm_to_vmem [thread:$0]  %s202_s0, 128, %s18_s10, [#allocation3]  }
  0x12   :  { %142 = dma.done.wait [#allocation3], 128  }
  0x13   :  { %143 = vsyncadd [#allocation3], 4294967168  ;;  %v25_v0 = vlaneseq  ;;  %s149_s21 = smov [#allocation5]   ;;  %s150_s23 = smov [#allocation6]   ;;  %v24_v3 = vld [vmem:[#allocation2] sm:$0xff] }
  0x14   :  { %s50_s22 = sshll.u32 %s149_s21, 4  ;;  %s60_s24 = sshll.u32 %s150_s23, 4  ;;  %s51_s22 = int_to_ptr.vmem [resolvable:$true] %s50_s22  ;;  %s61_s24 = int_to_ptr.vmem [resolvable:$true] %s60_s24 }
  0x15   :  { %v26_v1 = vand.u32 127, %v25_v0  ;;  %s98_s25 = scalar_lea.vmem %s51_s22, 128  ;;  %p103_p9 = scmp.lt.s32.totalorder %s51_s22, %s51_s22 }
  0x16   :  { %p99_p8 = scmp.ne.s32.totalorder %s51_s22, %s98_s25  ;;  %p104_p10 = scmp.lt.s32.totalorder %s98_s25, %s98_s25 }
  0x17   :  { %v31_v2 = vand.u32 31, %v26_v1 }
  0x18   :  { %p105_p11 = por %p104_p10, %p103_p9 }
  0x19   :  { %vm39_vm0 = vcmp.lt.s32.totalorder %v31_v2, 16 }
  0x1a   :  { %v40_v4 = vsel %vm39_vm0, %v24_v3, 0.0  ;;  %v42_v5 = vsel %vm39_vm0, 0.0, %v24_v3  ;;  %p106_p12 = pnand %p105_p11, %p99_p8 }
  0x1b   :  { %41 = vst [vmem:[#allocation5] sm:$0xff] %v40_v4  ;;  %43 = vst [vmem:[#allocation6] sm:$0xff] %v42_v5 }
  0x1c   :  { %109 = shalt.err (!%p106_p12)
}
  0x1d   :  { %s110_s27 = scalar_lea.hbm %s203_s1, 128 }
  0x1e   :  { %p111_p13 = scmp.ne.s32.totalorder %s203_s1, %s110_s27  ;;  %p114_p0 = scmp.lt.u32.totalorder %s110_s27, %s203_s1 }
  0x20   :  { %p116_p1 = pnand %p114_p0, %p111_p13 }
  0x22   :  { %119 = shalt.err (!%p116_p1)
}
  0x23   :  { %53 = dma.vmem_to_hbm [thread:$0]  %s51_s22, 128, %s203_s1, [#allocation4]  }
  0x24   :  { %s120_s6 = scalar_lea.vmem %s61_s24, 128  ;;  %p125_p3 = scmp.lt.s32.totalorder %s61_s24, %s61_s24 }
  0x25   :  { %p121_p2 = scmp.ne.s32.totalorder %s61_s24, %s120_s6  ;;  %p126_p4 = scmp.lt.s32.totalorder %s120_s6, %s120_s6 }
  0x27   :  { %p127_p5 = por %p126_p4, %p125_p3 }
  0x29   :  { %p128_p6 = pnand %p127_p5, %p121_p2 }
  0x2b   :  { %131 = shalt.err (!%p128_p6)
}
  0x2c   :  { %s132_s9 = scalar_lea.hbm %s204_s2, 128 }
  0x2d   :  { %p133_p7 = scmp.ne.s32.totalorder %s204_s2, %s132_s9  ;;  %p136_p8 = scmp.lt.u32.totalorder %s132_s9, %s204_s2 }
  0x2f   :  { %p138_p9 = pnand %p136_p8, %p133_p7 }
  0x31   :  { %141 = shalt.err (!%p138_p9)
}
  0x32   :  { %63 = dma.vmem_to_hbm [thread:$0]  %s61_s24, 128, %s204_s2, [#allocation7]  }
  0x33   :  { %144 = dma.done.wait [#allocation4], 128  }
  0x34   :  { %145 = vsyncadd [#allocation4], 4294967168 }
  0x35   :  { %146 = dma.done.wait [#allocation7], 128  }
  0x36   :  { %147 = vsyncadd [#allocation7], 4294967168 }
  0x37   :  { %70 = vsyncpa [#allocation3], 1 }
  0x38   :  { %71 = vsyncpa [#allocation4], 1 }
  0x39   :  { %72 = vsyncpa [#allocation7], 1 }

</bundles_post_ra>
